<compile_context>
chip_gen: v7x
topology: tpu7x:2x2x1
jax: 0.10.0
libtpu: 0.0.40
codegen_flags: <defaults>
</compile_context>

<pallas_src>
import functools
import math

import jax
import jax.numpy as jnp
from jax.experimental import pallas as pl
from jax.experimental.pallas import tpu as pltpu

_VMEM_LIMIT = 32 * 1024 * 1024
_EW_TM = 1024          # elementwise row tile
_MM_TM = 512           # matmul row tile (im2col fallback path)
_MM_TN = 512           # matmul col tile
_MM_TK_FULL = 4096     # K <= this -> single full-K block, no accumulator
_MM_TK = 2048          # K step for the (rare) large-K matmuls


def _round_up(x, m):
    return (x + m - 1) // m * m


# ----------------------------------------------------------------------------
# Tiled MXU matmul (fallback path for downsample / inverse convs, linears,
# Conv2d).  bf16 operands, f32 output.
# ----------------------------------------------------------------------------

def _matmul_kernel_1k(a_ref, b_ref, o_ref):
    o_ref[...] = jnp.dot(a_ref[...], b_ref[...],
                         preferred_element_type=jnp.float32)


def _matmul_kernel_mk(a_ref, b_ref, o_ref, acc_ref):
    @pl.when(pl.program_id(2) == 0)
    def _():
        acc_ref[...] = jnp.zeros_like(acc_ref)

    acc_ref[...] += jnp.dot(a_ref[...], b_ref[...],
                            preferred_element_type=jnp.float32)

    @pl.when(pl.program_id(2) == pl.num_programs(2) - 1)
    def _():
        o_ref[...] = acc_ref[...]


@jax.jit
def pallas_matmul(a, b):
    """f32/bf16 [M,K] @ [K,N] -> f32 [M,N] via MXU kernel (bf16 operands)."""
    M, K = a.shape
    _, N = b.shape
    a = a.astype(jnp.bfloat16)
    b = b.astype(jnp.bfloat16)

    # Row tiling: M here is always a small multiple of 8 -> usually no pad.
    if M <= _MM_TM:
        tm = _round_up(M, 8)
        Mp = tm
    else:
        tm = _MM_TM
        Mp = _round_up(M, tm)
    if Mp != M:
        a = jnp.pad(a, ((0, Mp - M), (0, 0)))

    # Col tiling: use the full dim when small (no pad needed).
    if N <= _MM_TN:
        tn, Np = N, N
    else:
        tn = _MM_TN
        Np = _round_up(N, tn)
        if Np != N:
            b = jnp.pad(b, ((0, 0), (0, Np - N)))

    if K <= _MM_TK_FULL:
        out = pl.pallas_call(
            _matmul_kernel_1k,
            out_shape=jax.ShapeDtypeStruct((Mp, Np), jnp.float32),
            grid=(Mp // tm, Np // tn),
            in_specs=[pl.BlockSpec((tm, K), lambda i, j: (i, 0)),
                      pl.BlockSpec((K, tn), lambda i, j: (0, j))],
            out_specs=pl.BlockSpec((tm, tn), lambda i, j: (i, j)),
            compiler_params=pltpu.CompilerParams(
                dimension_semantics=("parallel", "parallel"),
                vmem_limit_bytes=_VMEM_LIMIT),
        )(a, b)
    else:
        tk = _MM_TK
        Kp = _round_up(K, tk)
        if Kp != K:
            a = jnp.pad(a, ((0, 0), (0, Kp - K)))
            b = jnp.pad(b, ((0, Kp - K), (0, 0)))
        out = pl.pallas_call(
            _matmul_kernel_mk,
            out_shape=jax.ShapeDtypeStruct((Mp, Np), jnp.float32),
            grid=(Mp // tm, Np // tn, Kp // tk),
            in_specs=[pl.BlockSpec((tm, tk), lambda i, j, k: (i, k)),
                      pl.BlockSpec((tk, tn), lambda i, j, k: (k, j))],
            out_specs=pl.BlockSpec((tm, tn), lambda i, j, k: (i, j)),
            scratch_shapes=[pltpu.VMEM((tm, tn), jnp.float32)],
            compiler_params=pltpu.CompilerParams(
                dimension_semantics=("parallel", "parallel", "arbitrary"),
                vmem_limit_bytes=_VMEM_LIMIT),
        )(a, b)
    return out[:M, :N]


# ----------------------------------------------------------------------------
# Fused elementwise kernels (activation / BN affine / mask / BN statistics)
# ----------------------------------------------------------------------------

def _act_apply(y, act):
    if act == "leaky":                       # LeakyReLU(negative_slope=0.01)
        return jnp.where(y >= 0.0, y, 0.01 * y)
    if act == "sigmoid":
        return jax.nn.sigmoid(y)
    return y


def _make_affine_kernel(act):
    def kernel(x_ref, s_ref, t_ref, m_ref, o_ref):
        y = x_ref[...] * s_ref[...] + t_ref[...]
        o_ref[...] = _act_apply(y, act) * m_ref[...]
    return kernel


def _make_act_stats_kernel(act):
    def kernel(x_ref, m_ref, y_ref, s_ref, q_ref, acc_s, acc_q):
        i = pl.program_id(0)

        @pl.when(i == 0)
        def _():
            acc_s[...] = jnp.zeros_like(acc_s)
            acc_q[...] = jnp.zeros_like(acc_q)

        y = _act_apply(x_ref[...], act) * m_ref[...]
        y_ref[...] = y
        acc_s[...] += jnp.sum(y, axis=0, keepdims=True)
        acc_q[...] += jnp.sum(y * y, axis=0, keepdims=True)

        @pl.when(i == pl.num_programs(0) - 1)
        def _():
            s_ref[...] = acc_s[...]
            q_ref[...] = acc_q[...]
    return kernel


_AFFINE_KERNELS = {a: _make_affine_kernel(a)
                   for a in ("none", "leaky", "sigmoid")}
_ACT_STATS_KERNELS = {a: _make_act_stats_kernel(a)
                      for a in ("none", "leaky", "sigmoid")}


def _row_tile(m):
    return m if m <= _EW_TM else _EW_TM


@functools.partial(jax.jit, static_argnames=("act",))
def act_stats_2d(x, mask, act):
    """One fused pass: y = act(x)*mask, plus per-channel sum / sum-of-squares."""
    M, C = x.shape
    tm = _row_tile(M)
    Mp = _round_up(M, tm)
    if Mp != M:
        x = jnp.pad(x, ((0, Mp - M), (0, 0)))
        mask = jnp.pad(mask, ((0, Mp - M), (0, 0)))
    y, s, q = pl.pallas_call(
        _ACT_STATS_KERNELS[act],
        out_shape=(jax.ShapeDtypeStruct((Mp, C), jnp.float32),
                   jax.ShapeDtypeStruct((1, C), jnp.float32),
                   jax.ShapeDtypeStruct((1, C), jnp.float32)),
        grid=(Mp // tm,),
        in_specs=[pl.BlockSpec((tm, C), lambda i: (i, 0)),
                  pl.BlockSpec((tm, 1), lambda i: (i, 0))],
        out_specs=(pl.BlockSpec((tm, C), lambda i: (i, 0)),
                   pl.BlockSpec((1, C), lambda i: (0, 0)),
                   pl.BlockSpec((1, C), lambda i: (0, 0))),
        scratch_shapes=[pltpu.VMEM((1, C), jnp.float32),
                        pltpu.VMEM((1, C), jnp.float32)],
        compiler_params=pltpu.CompilerParams(
            dimension_semantics=("arbitrary",),
            vmem_limit_bytes=_VMEM_LIMIT),
    )(x.astype(jnp.float32), mask.astype(jnp.float32))
    return y[:M], s, q


@functools.partial(jax.jit, static_argnames=("act",))
def affine_act_2d(x, mask, scale, shift, act):
    """Fused (x*scale + shift) -> activation -> *mask."""
    M, C = x.shape
    tm = _row_tile(M)
    Mp = _round_up(M, tm)
    if Mp != M:
        x = jnp.pad(x, ((0, Mp - M), (0, 0)))
        mask = jnp.pad(mask, ((0, Mp - M), (0, 0)))
    out = pl.pallas_call(
        _AFFINE_KERNELS[act],
        out_shape=jax.ShapeDtypeStruct((Mp, C), jnp.float32),
        grid=(Mp // tm,),
        in_specs=[pl.BlockSpec((tm, C), lambda i: (i, 0)),
                  pl.BlockSpec((1, C), lambda i: (0, 0)),
                  pl.BlockSpec((1, C), lambda i: (0, 0)),
                  pl.BlockSpec((tm, 1), lambda i: (i, 0))],
        out_specs=pl.BlockSpec((tm, C), lambda i: (i, 0)),
        compiler_params=pltpu.CompilerParams(
            dimension_semantics=("parallel",),
            vmem_limit_bytes=_VMEM_LIMIT),
    )(x.astype(jnp.float32), scale.reshape(1, C).astype(jnp.float32),
      shift.reshape(1, C).astype(jnp.float32), mask.astype(jnp.float32))
    return out[:M]


# BatchNorm1d (training mode, gamma=1 beta=0) over the active voxels.
def _bn_params(s, q, n, eps=1e-5):
    mean = s / n
    var = jnp.maximum(q / n - mean * mean, 0.0)
    scale = jax.lax.rsqrt(var + eps)
    shift = -mean * scale
    return scale, shift


def act_then_bn(x, mask, act="leaky"):
    C = x.shape[-1]
    x2 = x.reshape(-1, C)
    m2 = mask.reshape(-1, 1).astype(jnp.float32)
    n = jnp.maximum(jnp.sum(mask.astype(jnp.float32)), 1.0)
    y2, s, q = act_stats_2d(x2, m2, act)
    scale, shift = _bn_params(s[0], q[0], n)
    return affine_act_2d(y2, m2, scale, shift, "none").reshape(x.shape)


def bn_then_act(x, mask, act):
    C = x.shape[-1]
    x2 = x.reshape(-1, C)
    m2 = mask.reshape(-1, 1).astype(jnp.float32)
    n = jnp.maximum(jnp.sum(mask.astype(jnp.float32)), 1.0)
    y2, s, q = act_stats_2d(x2, m2, "none")
    scale, shift = _bn_params(s[0], q[0], n)
    return affine_act_2d(y2, m2, scale, shift, act).reshape(x.shape)


# ----------------------------------------------------------------------------
# Fused SubMConv3d kernel (stride 1, 'same' padding).  No im2col: the padded
# per-batch activation slab is resident in VMEM and the tap loop runs inside
# the kernel, accumulating bf16 MXU matmuls into the f32 output block.
# ----------------------------------------------------------------------------

def _make_subm_kernel(X, Y, Z, Cin, offsets):
    XYZ = X * Y * Z

    def kernel(xp_ref, w_ref, b_ref, o_ref):
        def tap(t):
            dx, dy, dz = offsets[t]
            win = xp_ref[0, dx:dx + X, dy:dy + Y, dz:dz + Z, :]
            lhs = win.reshape(XYZ, Cin).astype(jnp.bfloat16)
            return jnp.dot(lhs, w_ref[t], preferred_element_type=jnp.float32)

        o_ref[0] = b_ref[...] + tap(0)          # bias folded into the kernel
        for t in range(1, len(offsets)):
            o_ref[0] = o_ref[0] + tap(t)

    return kernel


@functools.partial(jax.jit, static_argnames=("apply_mask",))
def subm_conv(x, w, mask, bias=None, apply_mask=False):
    """SubMConv3d emulation over a dense masked grid (stride 1, 'same' pad)."""
    kx, ky, kz, Cin, Cout = w.shape
    B, X, Y, Z, _ = x.shape
    px, py, pz = kx // 2, ky // 2, kz // 2
    Xp, Yp, Zp = X + 2 * px, Y + 2 * py, Z + 2 * pz
    XYZ = X * Y * Z

    xp = jnp.pad(x.astype(jnp.float32),
                 ((0, 0), (px, px), (py, py), (pz, pz), (0, 0)))
    offsets = tuple((dx, dy, dz)
                    for dx in range(kx) for dy in range(ky) for dz in range(kz))
    T = len(offsets)
    w_t = w.reshape(T, Cin, Cout).astype(jnp.bfloat16)
    if bias is None:
        bias2 = jnp.zeros((1, Cout), jnp.float32)
    else:
        bias2 = bias.reshape(1, Cout).astype(jnp.float32)

    # Tile the output channels so the resident weight block stays small.
    tcout = 256 if (Cout > 256 and Cout % 256 == 0) else Cout
    ncj = Cout // tcout

    kernel = _make_subm_kernel(X, Y, Z, Cin, offsets)
    out = pl.pallas_call(
        kernel,
        out_shape=jax.ShapeDtypeStruct((B, XYZ, Cout), jnp.float32),
        grid=(B, ncj),
        in_specs=[
            pl.BlockSpec((1, Xp, Yp, Zp, Cin), lambda b, j: (b, 0, 0, 0, 0)),
            pl.BlockSpec((T, Cin, tcout), lambda b, j: (0, 0, j)),
            pl.BlockSpec((1, tcout), lambda b, j: (0, j)),
        ],
        out_specs=pl.BlockSpec((1, XYZ, tcout), lambda b, j: (b, 0, j)),
        compiler_params=pltpu.CompilerParams(
            dimension_semantics=("parallel", "parallel"),
            vmem_limit_bytes=_VMEM_LIMIT),
    )(xp, w_t, bias2)
    out = out.reshape(B, X, Y, Z, Cout)
    if apply_mask:
        out = out * mask[..., None]
    return out


# ----------------------------------------------------------------------------
# Remaining sparse-conv building blocks (im2col glue + Pallas matmul)
# ----------------------------------------------------------------------------

def scatter_to_dense(feat, coors, grid_shape):
    B, X, Y, Z = grid_shape
    C = feat.shape[-1]
    d = jnp.zeros((B, X, Y, Z, C), jnp.float32)
    return d.at[coors[:, 0], coors[:, 1], coors[:, 2], coors[:, 3]].set(feat)


def sparse_conv_down(x, w, mask, stride):
    """SparseConv3d kernel 3, padding 1, given stride; returns (out, out_mask).

    TODO(synk): this strided downsample conv still uses a small im2col matrix
    (its tensors are tiny compared to the SubM path, which is fully fused).
    """
    B, X, Y, Z, cin = x.shape
    cout = w.shape[-1]
    sx, sy, sz = stride
    OX, OY, OZ = (X - 1) // sx + 1, (Y - 1) // sy + 1, (Z - 1) // sz + 1
    xp = jnp.pad(x, ((0, 0), (1, 1), (1, 1), (1, 1), (0, 0)))
    mp = jnp.pad(mask, ((0, 0), (1, 1), (1, 1), (1, 1)))
    cols = []
    mout = jnp.zeros((B, OX, OY, OZ), jnp.float32)
    for dx in range(3):
        for dy in range(3):
            for dz in range(3):
                sl = (slice(None),
                      slice(dx, dx + (OX - 1) * sx + 1, sx),
                      slice(dy, dy + (OY - 1) * sy + 1, sy),
                      slice(dz, dz + (OZ - 1) * sz + 1, sz))
                cols.append(xp[sl + (slice(None),)])
                mout = jnp.maximum(mout, mp[sl])
    col = jnp.concatenate(cols, axis=-1).reshape(B * OX * OY * OZ, 27 * cin)
    y = pallas_matmul(col, w.reshape(-1, cout)).reshape(B, OX, OY, OZ, cout)
    return y * mout[..., None], mout


def sparse_inverse_conv(x, w, mask_out, out_spatial, stride):
    """SparseInverseConv3d (kernel 3) undoing a stride-`stride` pad-1 conv.

    TODO(synk): spconv pairs kernel offsets via the stored rulebook (flipped
    index convention); with synthetic weights the standard transposed-conv
    offset convention is used, and the 27 strided scatter-adds stay in XLA.
    """
    B, OX, OY, OZ, cin = x.shape
    Xo, Yo, Zo = out_spatial
    cout = w.shape[-1]
    sx, sy, sz = stride
    w2 = jnp.transpose(w, (3, 0, 1, 2, 4)).reshape(cin, 27 * cout)
    y = pallas_matmul(x.reshape(-1, cin), w2).reshape(B, OX, OY, OZ, 3, 3, 3, cout)
    out = jnp.zeros((B, Xo + 2, Yo + 2, Zo + 2, cout), jnp.float32)
    for dx in range(3):
        for dy in range(3):
            for dz in range(3):
                out = out.at[:,
                             dx:dx + (OX - 1) * sx + 1:sx,
                             dy:dy + (OY - 1) * sy + 1:sy,
                             dz:dz + (OZ - 1) * sz + 1:sz, :].add(
                    y[:, :, :, :, dx, dy, dz, :])
    out = out[:, 1:1 + Xo, 1:1 + Yo, 1:1 + Zo, :]
    return out * mask_out[..., None]


def sparse_maxpool_z(x, mask):
    """SparseMaxPool3d((1,1,Z)) -> collapse z; masked max over active voxels."""
    mb = mask > 0
    neg = jnp.where(mb[..., None], x, -jnp.inf)
    mx = jnp.max(neg, axis=3, keepdims=True)
    outm = jnp.any(mb, axis=3, keepdims=True)
    out = jnp.where(outm[..., None], mx, 0.0)
    return out, outm.astype(jnp.float32)


def conv2d(x_cl, w, b, pad_h, pad_w):
    """Dense Conv2d on channels-last [B,H,W,Cin] via im2col + Pallas matmul."""
    B, H, W, cin = x_cl.shape
    kh, kw, _, cout = w.shape
    xp = jnp.pad(x_cl, ((0, 0), (pad_h, pad_h), (pad_w, pad_w), (0, 0)))
    OH = H + 2 * pad_h - kh + 1
    OW = W + 2 * pad_w - kw + 1
    cols = []
    for dh in range(kh):
        for dw in range(kw):
            cols.append(xp[:, dh:dh + OH, dw:dw + OW, :])
    col = jnp.concatenate(cols, axis=-1).reshape(B * OH * OW, kh * kw * cin)
    y = pallas_matmul(col, w.reshape(-1, cout)) + b
    return y.reshape(B, OH, OW, cout)


# ----------------------------------------------------------------------------
# Network blocks (mirroring the PyTorch modules)
# ----------------------------------------------------------------------------

def res_context_block(p, x, mask):
    sc = subm_conv(x, p["conv1"], mask)       # conv1x3 : (1,3,3)
    sc = act_then_bn(sc, mask)
    sc = subm_conv(sc, p["conv1_2"], mask)    # conv3x1 : (3,1,3)
    sc = act_then_bn(sc, mask)
    rA = subm_conv(x, p["conv2"], mask)       # conv3x1
    rA = act_then_bn(rA, mask)
    rA = subm_conv(rA, p["conv3"], mask)      # conv1x3
    rA = act_then_bn(rA, mask)
    return rA + sc


def res_block(p, x, mask, stride):
    sc = subm_conv(x, p["conv1"], mask)       # conv3x1 : (3,1,3)
    sc = act_then_bn(sc, mask)
    sc = subm_conv(sc, p["conv1_2"], mask)    # conv1x3 : (1,3,3)
    sc = act_then_bn(sc, mask)
    rA = subm_conv(x, p["conv2"], mask)       # conv1x3
    rA = act_then_bn(rA, mask)
    rA = subm_conv(rA, p["conv3"], mask)      # conv3x1
    rA = act_then_bn(rA, mask)
    rA = rA + sc
    rB, mask_out = sparse_conv_down(rA, p["pool"], mask, stride)
    return rB, rA, mask_out


def up_block(p, x, skip, mask_in, mask_out, stride):
    upA = subm_conv(x, p["trans"], mask_in)   # conv3x3 : (3,3,3)
    upA = act_then_bn(upA, mask_in)
    upA = sparse_inverse_conv(upA, p["up"], mask_out, skip.shape[1:4], stride)
    upA = upA + skip
    upE = subm_conv(upA, p["conv1"], mask_out)   # (1,3,3)
    upE = act_then_bn(upE, mask_out)
    upE = subm_conv(upE, p["conv2"], mask_out)   # (3,1,3)
    upE = act_then_bn(upE, mask_out)
    upE = subm_conv(upE, p["conv3"], mask_out)   # (3,3,3)
    upE = act_then_bn(upE, mask_out)
    return upE


def recon_block(p, x, mask):
    s1 = bn_then_act(subm_conv(x, p["conv1"], mask), mask, "sigmoid")    # (3,1,1)
    s2 = bn_then_act(subm_conv(x, p["conv1_2"], mask), mask, "sigmoid")  # (1,3,1)
    s3 = bn_then_act(subm_conv(x, p["conv1_3"], mask), mask, "sigmoid")  # (1,1,3)
    return (s1 + s2 + s3) * x


# ----------------------------------------------------------------------------
# Parameter init (deterministic, synthetic)
# ----------------------------------------------------------------------------

class KeyGen:
    def __init__(self, seed):
        self.key = jax.random.PRNGKey(seed)

    def __call__(self):
        self.key, sub = jax.random.split(self.key)
        return sub


def conv_w(kg, ks, cin, cout):
    fan = ks[0] * ks[1] * ks[2] * cin
    return jax.random.normal(kg(), (ks[0], ks[1], ks[2], cin, cout),
                             jnp.float32) / math.sqrt(fan)


def init_linear(kg, fin, fout):
    return dict(w=jax.random.normal(kg(), (fin, fout), jnp.float32) / math.sqrt(fin),
                b=jnp.zeros((fout,), jnp.float32))


def make_rescontext(kg, cin, cout):
    return dict(conv1=conv_w(kg, (1, 3, 3), cin, cout),
                conv1_2=conv_w(kg, (3, 1, 3), cout, cout),
                conv2=conv_w(kg, (3, 1, 3), cin, cout),
                conv3=conv_w(kg, (1, 3, 3), cout, cout))


def make_resblock(kg, cin, cout):
    return dict(conv1=conv_w(kg, (3, 1, 3), cin, cout),
                conv1_2=conv_w(kg, (1, 3, 3), cout, cout),
                conv2=conv_w(kg, (1, 3, 3), cin, cout),
                conv3=conv_w(kg, (3, 1, 3), cout, cout),
                pool=conv_w(kg, (3, 3, 3), cout, cout))


def make_upblock(kg, cin, cout):
    return dict(trans=conv_w(kg, (3, 3, 3), cin, cout),
                up=conv_w(kg, (3, 3, 3), cout, cout),
                conv1=conv_w(kg, (1, 3, 3), cout, cout),
                conv2=conv_w(kg, (3, 1, 3), cout, cout),
                conv3=conv_w(kg, (3, 3, 3), cout, cout))


def make_recon(kg, cin, cout):
    return dict(conv1=conv_w(kg, (3, 1, 1), cin, cout),
                conv1_2=conv_w(kg, (1, 3, 1), cin, cout),
                conv1_3=conv_w(kg, (1, 1, 3), cin, cout))


def init_params(seed, num_input_features, num_seg_features, init_size, nclasses):
    kg = KeyGen(seed)
    i = init_size
    p = {}
    p["down_seg"] = init_linear(kg, num_seg_features, i)
    p["down_pix"] = init_linear(kg, num_seg_features, i)
    p["downCntx"] = make_rescontext(kg, num_input_features, i)
    p["resBlock2"] = make_resblock(kg, i, 2 * i)
    p["resBlock3"] = make_resblock(kg, 2 * i, 4 * i)
    p["resBlock4"] = make_resblock(kg, 4 * i, 8 * i)
    p["resBlock5"] = make_resblock(kg, 8 * i, 16 * i)
    p["upBlock0"] = make_upblock(kg, 16 * i, 16 * i)
    p["upBlock1"] = make_upblock(kg, 16 * i, 8 * i)
    p["upBlock2"] = make_upblock(kg, 8 * i, 4 * i)
    p["upBlock3"] = make_upblock(kg, 4 * i, 2 * i)
    p["ReconNet"] = make_recon(kg, 2 * i, 2 * i)
    p["logits"] = dict(w=conv_w(kg, (3, 3, 3), 4 * i, nclasses),
                       b=jnp.zeros((nclasses,), jnp.float32))
    for name in ("heatmap", "offset", "instmap"):
        p[f"upBlock3_ins_{name}"] = make_upblock(kg, 4 * i, 2 * i)
        p[f"ReconNet_ins_{name}"] = make_recon(kg, 2 * i, 2 * i)
    p["compress_offset"] = dict(w=conv_w(kg, (3, 3, 3), 4 * i, 32),
                                b=jnp.zeros((32,), jnp.float32))
    p["compress_instmap"] = dict(w=conv_w(kg, (3, 3, 3), 4 * i, 32),
                                 b=jnp.zeros((32,), jnp.float32))
    p["logits_offset"] = dict(
        w=jax.random.normal(kg(), (3, 3, 32, 2), jnp.float32) / math.sqrt(9 * 32),
        b=jnp.zeros((2,), jnp.float32))
    p["logits_instmap"] = dict(
        w=jax.random.normal(kg(), (3, 3, 32, 2), jnp.float32) / math.sqrt(9 * 32),
        b=jnp.zeros((2,), jnp.float32))
    p["secon_compress0"] = dict(w=conv_w(kg, (3, 3, 3), 64 * 3, 2 * 2 * i),
                                b=jnp.zeros((2 * 2 * i,), jnp.float32))
    p["resSeg"] = make_resblock(kg, i, 2 * i)
    p["resPix"] = make_resblock(kg, i, 2 * i)
    p["downCntxSeg"] = make_rescontext(kg, i, i)
    p["downCntxPix"] = make_rescontext(kg, i, i)
    p["down_geo"] = init_linear(kg, 128, 64)
    # seconBlock0/1, seconup0/1 and the TransformerEncoder are constructed in
    # __init__ but never executed in forward(); they are intentionally omitted.
    return p


# ----------------------------------------------------------------------------
# Full forward pass
# ----------------------------------------------------------------------------

def asymm_3d_forward(params, voxel_features, coors, batch_size, pooled,
                     sparse_shape):
    B = batch_size
    X, Y, Z = sparse_shape
    coors = coors.astype(jnp.int32)

    mask0 = jnp.zeros((B, X, Y, Z), jnp.float32).at[
        coors[:, 0], coors[:, 1], coors[:, 2], coors[:, 3]].set(1.0)
    ret = scatter_to_dense(voxel_features, coors, (B, X, Y, Z))

    feat_seg = pallas_matmul(pooled[0], params["down_seg"]["w"]) + params["down_seg"]["b"]
    feat_pix = pallas_matmul(pooled[1], params["down_pix"]["w"]) + params["down_pix"]["b"]
    ret_seg = scatter_to_dense(feat_seg, coors, (B, X, Y, Z))
    ret_pix = scatter_to_dense(feat_pix, coors, (B, X, Y, Z))

    ret = res_context_block(params["downCntx"], ret, mask0)
    down1c, down1b, mask1 = res_block(params["resBlock2"], ret, mask0, (2, 2, 2))
    down2c, down2b, mask2 = res_block(params["resBlock3"], down1c, mask1, (2, 2, 2))
    down3c, down3b, mask3 = res_block(params["resBlock4"], down2c, mask2, (2, 2, 1))
    down4c, down4b, mask4 = res_block(params["resBlock5"], down3c, mask3, (2, 2, 1))

    up4e = up_block(params["upBlock0"], down4c, down4b, mask4, mask3, (2, 2, 1))
    up3e = up_block(params["upBlock1"], up4e, down3b, mask3, mask2, (2, 2, 1))
    up2e = up_block(params["upBlock2"], up3e, down2b, mask2, mask1, (2, 2, 2))

    ret_seg = res_context_block(params["downCntxSeg"], ret_seg, mask0)
    ret_pix = res_context_block(params["downCntxPix"], ret_pix, mask0)
    down_seg, down_seg2, _ = res_block(params["resSeg"], ret_seg, mask0, (2, 2, 2))
    down_pix, down_pix2, _ = res_block(params["resPix"], ret_pix, mask0, (2, 2, 2))

    # down_geo: Linear(128 -> 64) on up2e features (masked: bias must not leak)
    Bh, Xh, Yh, Zh, Cu = up2e.shape
    up2e_f = pallas_matmul(up2e.reshape(-1, Cu), params["down_geo"]["w"]) + params["down_geo"]["b"]
    up2e = up2e_f.reshape(Bh, Xh, Yh, Zh, -1) * mask1[..., None]

    # geometry / seg / pix fusion: interleaved concat == channel concat
    cat_fea = jnp.concatenate([up2e, down_seg, down_pix], axis=-1)       # [.., 192]
    down1b = down1b + down_seg2 + down_pix2
    scomp0 = subm_conv(cat_fea, params["secon_compress0"]["w"], mask1,
                       bias=params["secon_compress0"]["b"], apply_mask=True)

    def seg_head(up_p, rec_p):
        up1e = up_block(up_p, scomp0, down1b, mask1, mask0, (2, 2, 2))
        up0e = recon_block(rec_p, up1e, mask0)
        return jnp.concatenate([up0e, up1e], axis=-1)

    # semantic logits
    up0e_cat = seg_head(params["upBlock3"], params["ReconNet"])
    logits = subm_conv(up0e_cat, params["logits"]["w"], mask0,
                       bias=params["logits"]["b"], apply_mask=True)
    logits = jnp.transpose(logits, (0, 4, 1, 2, 3))          # .dense(): [B,ncls,X,Y,Z]

    # instance heatmap
    h_cat = seg_head(params["upBlock3_ins_heatmap"], params["ReconNet_ins_heatmap"])
    h_pool, _ = sparse_maxpool_z(h_cat, mask0)
    heatmap = jnp.transpose(h_pool[:, :, :, 0, :], (0, 3, 1, 2))   # [B,128,X,Y]

    def pix_head(up_p, rec_p, comp_p, c2d_p):
        cat = seg_head(up_p, rec_p)
        pooled_t, pmask = sparse_maxpool_z(cat, mask0)
        # compress SubMConv3d on the (X,Y,1) pooled grid: only the central z
        # kernel slice can contribute -> equivalent 2D 3x3 conv on the plane.
        x2d = pooled_t[:, :, :, 0, :]                         # [B,X,Y,128]
        pm2d = pmask[:, :, :, 0]
        comp = conv2d(x2d, comp_p["w"][:, :, 1, :, :], comp_p["b"], 1, 1)
        comp = comp * pm2d[..., None]                         # [B,X,Y,32]
        d2 = jnp.pad(comp, ((0, 0), (0, 0), (1, 1), (0, 0)), mode="wrap")  # circular W
        out = conv2d(d2, c2d_p["w"], c2d_p["b"], pad_h=1, pad_w=0)         # [B,X,Y,2]
        return jnp.transpose(out, (0, 3, 1, 2))               # [B,2,X,Y]

    offset = pix_head(params["upBlock3_ins_offset"], params["ReconNet_ins_offset"],
                      params["compress_offset"], params["logits_offset"])
    instmap = pix_head(params["upBlock3_ins_instmap"], params["ReconNet_ins_instmap"],
                       params["compress_instmap"], params["logits_instmap"])

    # scomp0.features: gather active voxels at the half-resolution grid.
    # (data-dependent shape -> kept outside jax.jit on purpose)
    scomp0_features = scomp0.reshape(-1, scomp0.shape[-1])[mask1.reshape(-1) > 0]
    return logits, heatmap, offset, instmap, scomp0_features


# ----------------------------------------------------------------------------
# Main
# ----------------------------------------------------------------------------

if __name__ == "__main__":
    # Small, shape-consistent configuration.
    B = 2
    X, Y, Z = 8, 8, 32            # sparse_shape; Z == 32 matches SparseMaxPool3d((1,1,32))
    init_size = 32                # forced by the hard-coded 64*3 fusion / Linear(128,64)
    num_input_features = 16
    num_seg_features = 32
    nclasses = 20
    n_per_batch = 256

    params = init_params(42, num_input_features, num_seg_features, init_size, nclasses)

    key = jax.random.PRNGKey(0)
    k_idx, k_feat, k_seg, k_pix = jax.random.split(key, 4)

    coor_list = []
    for b in range(B):
        perm = jax.random.permutation(jax.random.fold_in(k_idx, b), X * Y * Z)[:n_per_batch]
        xs = perm // (Y * Z)
        ys = (perm // Z) % Y
        zs = perm % Z
        coor_list.append(jnp.stack([jnp.full_like(xs, b), xs, ys, zs], axis=1))
    coors = jnp.concatenate(coor_list, axis=0).astype(jnp.int32)   # [N, 4] = (b, x, y, z)

    N = coors.shape[0]
    voxel_features = jax.random.normal(k_feat, (N, num_input_features), jnp.float32)
    pooled = (jax.random.normal(k_seg, (N, num_seg_features), jnp.float32),
              jax.random.normal(k_pix, (N, num_seg_features), jnp.float32))

    outs = asymm_3d_forward(params, voxel_features, coors, B, pooled, (X, Y, Z))
    for o in outs:
        jax.block_until_ready(o)
    print("KERNEL_OK")
</pallas_src>

<mosaic_0001>
module attributes {stable_mosaic.version = 11 : i64} {
  func.func @_matmul_kernel_1k(%arg0: i32, %arg1: i32, %arg2: memref<512x32xbf16, #tpu.memory_space<vmem>>, %arg3: memref<32x32xbf16, #tpu.memory_space<vmem>>, %arg4: memref<512x32xf32, #tpu.memory_space<vmem>>) attributes {dimension_semantics = [#tpu.dimension_semantics<parallel>, #tpu.dimension_semantics<parallel>], iteration_bounds = array<i64: 1, 1>, scalar_prefetch = 0 : i64, scratch_operands = 0 : i64, tpu.core_type = #tpu.core_type<tc>, window_params = [{transform_indices = @transform_0, window_bounds = array<i64: 512, 32>}, {transform_indices = @transform_1, window_bounds = array<i64: 32, 32>}, {transform_indices = @transform_2, window_bounds = array<i64: 512, 32>}]} {
    %c0 = arith.constant 0 : index
    %c0_0 = arith.constant 0 : index
    %0 = vector.load %arg2[%c0, %c0_0] : memref<512x32xbf16, #tpu.memory_space<vmem>>, vector<512x32xbf16>
    %c0_1 = arith.constant 0 : index
    %c0_2 = arith.constant 0 : index
    %1 = vector.load %arg3[%c0_1, %c0_2] : memref<32x32xbf16, #tpu.memory_space<vmem>>, vector<32x32xbf16>
    %cst = arith.constant dense<0.000000e+00> : vector<512x32xf32>
    %2 = tpu.matmul %0, %1, %cst {dimension_numbers = #tpu.dot_dimension_numbers<[1], [0], [0], [1], [0, 0, 1, 1], [], []>} : vector<512x32xbf16>, vector<32x32xbf16>, vector<512x32xf32> -> vector<512x32xf32>
    %c0_3 = arith.constant 0 : index
    %c0_4 = arith.constant 0 : index
    %3 = vector.load %arg4[%c0_3, %c0_4] : memref<512x32xf32, #tpu.memory_space<vmem>>, vector<512x32xf32>
    tpu.vector_store %arg4[%c0_3, %c0_4], %2 {strides = array<i32>} : memref<512x32xf32, #tpu.memory_space<vmem>>, vector<512x32xf32>,
    return
  }
  func.func @transform_0(%arg0: i32, %arg1: i32) -> (i32, i32) {
    %c0_i32 = arith.constant 0 : i32
    %c0_i32_0 = arith.constant 0 : i32
    return %arg0, %c0_i32 : i32, i32
  }
  func.func @transform_1(%arg0: i32, %arg1: i32) -> (i32, i32) {
    %c0_i32 = arith.constant 0 : i32
    %c0_i32_0 = arith.constant 0 : i32
    return %c0_i32, %arg1 : i32, i32
  }
  func.func @transform_2(%arg0: i32, %arg1: i32) -> (i32, i32) {
    %c0_i32 = arith.constant 0 : i32
    return %arg0, %arg1 : i32, i32
  }
}

</mosaic_0001>

<bundles_post_ra>
// kernel: pallas_matmul.1
= control target key start
LH: loop header
LB: loop body
LE: loop exit
PB: predicated region body
PF: predicated region fallthrough
CT: control target
= control target key end

     0   :  { %vm252_vm0 = vcmask 261120   ;;  %s1317_s1 = inlined_call_operand.vmem [shape: bf16[32,32], index: 1, kind: input, shape index: {}]   ;;  %s1318_s0 = inlined_call_operand.vmem [shape: bf16[512,32], index: 0, kind: input, shape index: {}]   ;;  %s1319_s2 = inlined_call_operand.vmem [shape: f32[512,32], index: 2, kind: output, shape index: {}]  }
   0x1   :  { %v878_v0 = vld [vmem:[%s1317_s1] sm:$0xff]   ;;  %v879_v1 = vld [vmem:[%s1317_s1 + $0x8] sm:$0xff]   ;;  %v884_v6 = vld [vmem:[%s1318_s0 + $0x10] sm:$0xff]  }
   0x2   :  { %806 = vmatprep.subr.bf16.mxu0 %v878_v0  ;;  %874 = vmatprep.subr.bf16.mxu1 %v878_v0  ;;  %v880_v2 = vld [vmem:[%s1318_s0] sm:$0xff]   ;;  %v882_v4 = vld [vmem:[%s1318_s0 + $0x8] sm:$0xff]   ;;  %v885_v7 = vld [vmem:[%s1318_s0 + $0x90] sm:$0xff]  }
   0x3   :  { %807 = vmatpush3.bf16.msra.mxu0 %v878_v0  ;;  %876 = vmatpush3.bf16.msra.mxu1 %v878_v0  ;;  %v881_v3 = vld [vmem:[%s1318_s0 + $0x80] sm:$0xff]   ;;  %v883_v5 = vld [vmem:[%s1318_s0 + $0x88] sm:$0xff]   ;;  %v886_v8 = vld [vmem:[%s1318_s0 + $0x18] sm:$0xff]  }
   0x4   :  { %808 = vmatprep.subr.bf16.mxu0 %v879_v1  ;;  %875 = vmatprep.subr.bf16.mxu1 %v879_v1  ;;  %v887_v9 = vld [vmem:[%s1318_s0 + $0x98] sm:$0xff]   ;;  %v888_v10 = vld [vmem:[%s1318_s0 + $0x20] sm:$0xff]   ;;  %v890_v12 = vld [vmem:[%s1318_s0 + $0x28] sm:$0xff]  }
   0x5   :  { %810 = vmatprep.mubr.msk.bf16.mxu0 %vm252_vm0, %v880_v2  ;;  %842 = vmatprep.mubr.msk.bf16.mxu1 %vm252_vm0, %v881_v3  ;;  %v889_v11 = vld [vmem:[%s1318_s0 + $0xa0] sm:$0xff]   ;;  %v891_v13 = vld [vmem:[%s1318_s0 + $0xa8] sm:$0xff]   ;;  %v892_v14 = vld [vmem:[%s1318_s0 + $0x30] sm:$0xff]  }
   0x6   :  { %v893_v15 = vld [vmem:[%s1318_s0 + $0xb0] sm:$0xff]   ;;  %v894_v16 = vld [vmem:[%s1318_s0 + $0x38] sm:$0xff]   ;;  %v896_v18 = vld [vmem:[%s1318_s0 + $0x40] sm:$0xff]  }
   0x7   :  { %809 = vmatpush3.bf16.msra.mxu0 %v879_v1  ;;  %877 = vmatpush3.bf16.msra.mxu1 %v879_v1  ;;  %v895_v17 = vld [vmem:[%s1318_s0 + $0xb8] sm:$0xff]   ;;  %v897_v19 = vld [vmem:[%s1318_s0 + $0xc0] sm:$0xff]   ;;  %v898_v20 = vld [vmem:[%s1318_s0 + $0x48] sm:$0xff]  }
   0x8   :  { %v899_v21 = vld [vmem:[%s1318_s0 + $0xc8] sm:$0xff]   ;;  %v900_v22 = vld [vmem:[%s1318_s0 + $0x50] sm:$0xff]   ;;  %v902_v24 = vld [vmem:[%s1318_s0 + $0x58] sm:$0xff]  }
   0x9   :  { %v901_v23 = vld [vmem:[%s1318_s0 + $0xd0] sm:$0xff]   ;;  %v903_v25 = vld [vmem:[%s1318_s0 + $0xd8] sm:$0xff]   ;;  %v904_v26 = vld [vmem:[%s1318_s0 + $0x60] sm:$0xff]  }
   0xa   :  { %811 = vmatmul.mubr.msk.bf16.vlgmr.msra.gmra.mrb[0].mxu0 %vm252_vm0, %v882_v4  ;;  %843 = vmatmul.mubr.msk.bf16.vlgmr.msra.gmra.mrb[0].mxu1 %vm252_vm0, %v883_v5  ;;  %v905_v27 = vld [vmem:[%s1318_s0 + $0xe0] sm:$0xff]   ;;  %v906_v28 = vld [vmem:[%s1318_s0 + $0x68] sm:$0xff]   ;;  %v908_v30 = vld [vmem:[%s1318_s0 + $0x70] sm:$0xff]  }
   0xb   :  { %814 = vmatprep.mubr.msk.bf16.mxu0 %vm252_vm0, %v884_v6  ;;  %846 = vmatprep.mubr.msk.bf16.mxu1 %vm252_vm0, %v885_v7  ;;  %v907_v29 = vld [vmem:[%s1318_s0 + $0xe8] sm:$0xff]   ;;  %v909_v31 = vld [vmem:[%s1318_s0 + $0xf0] sm:$0xff]   ;;  %v910_v32 = vld [vmem:[%s1318_s0 + $0x78] sm:$0xff]  }
   0xc   :  { %v911_v33 = vld [vmem:[%s1318_s0 + $0xf8] sm:$0xff]  }
  0x12   :  { %815 = vmatmul.mubr.msk.bf16.gmra.mrb[4].mxu0 %vm252_vm0, %v886_v8  ;;  %847 = vmatmul.mubr.msk.bf16.gmra.mrb[4].mxu1 %vm252_vm0, %v887_v9 }
  0x13   :  { %818 = vmatprep.mubr.msk.bf16.mxu0 %vm252_vm0, %v888_v10  ;;  %850 = vmatprep.mubr.msk.bf16.mxu1 %vm252_vm0, %v889_v11 }
  0x1a   :  { %819 = vmatmul.mubr.msk.bf16.gmra.mrb[8].mxu0 %vm252_vm0, %v890_v12  ;;  %851 = vmatmul.mubr.msk.bf16.gmra.mrb[8].mxu1 %vm252_vm0, %v891_v13 }
  0x1b   :  { %822 = vmatprep.mubr.msk.bf16.mxu0 %vm252_vm0, %v892_v14  ;;  %854 = vmatprep.mubr.msk.bf16.mxu1 %vm252_vm0, %v893_v15 }
  0x22   :  { %823 = vmatmul.mubr.msk.bf16.gmra.mrb[12].mxu0 %vm252_vm0, %v894_v16  ;;  %855 = vmatmul.mubr.msk.bf16.gmra.mrb[12].mxu1 %vm252_vm0, %v895_v17 }
  0x23   :  { %826 = vmatprep.mubr.msk.bf16.mxu0 %vm252_vm0, %v896_v18  ;;  %858 = vmatprep.mubr.msk.bf16.mxu1 %vm252_vm0, %v897_v19 }
  0x2a   :  { %827 = vmatmul.mubr.msk.bf16.gmra.mrb[16].mxu0 %vm252_vm0, %v898_v20  ;;  %859 = vmatmul.mubr.msk.bf16.gmra.mrb[16].mxu1 %vm252_vm0, %v899_v21 }
  0x2b   :  { %830 = vmatprep.mubr.msk.bf16.mxu0 %vm252_vm0, %v900_v22  ;;  %862 = vmatprep.mubr.msk.bf16.mxu1 %vm252_vm0, %v901_v23 }
  0x32   :  { %831 = vmatmul.mubr.msk.bf16.gmra.mrb[20].mxu0 %vm252_vm0, %v902_v24  ;;  %863 = vmatmul.mubr.msk.bf16.gmra.mrb[20].mxu1 %vm252_vm0, %v903_v25 }
  0x33   :  { %834 = vmatprep.mubr.msk.bf16.mxu0 %vm252_vm0, %v904_v26  ;;  %866 = vmatprep.mubr.msk.bf16.mxu1 %vm252_vm0, %v905_v27 }
  0x3a   :  { %835 = vmatmul.mubr.msk.bf16.gmra.mrb[24].mxu0 %vm252_vm0, %v906_v28  ;;  %867 = vmatmul.mubr.msk.bf16.gmra.mrb[24].mxu1 %vm252_vm0, %v907_v29 }
  0x3b   :  { %838 = vmatprep.mubr.msk.bf16.mxu0 %vm252_vm0, %v908_v30  ;;  %870 = vmatprep.mubr.msk.bf16.mxu1 %vm252_vm0, %v909_v31 }
  0x42   :  { %839 = vmatmul.mubr.msk.bf16.gmra.mrb[28].mxu0 %vm252_vm0, %v910_v32  ;;  %871 = vmatmul.mubr.msk.bf16.gmra.mrb[28].mxu1 %vm252_vm0, %v911_v33 }
  0xdd   :  { %v812_v34 = vpop.f32.mrb[0].mxu0  ;;  %v844_v35 = vpop.f32.mrb[0].mxu1 }
  0xde   :  { %640 = vst.msk [vmem:[%s1319_s2 + $0x10] sm:$0xff] %vm252_vm0, %v812_v34  ;;  %672 = vst.msk [vmem:[%s1319_s2 + $0x110] sm:$0xff] %vm252_vm0, %v844_v35  ;;  %v383_v36 = vpop.f32.mrb[1].mxu0  ;;  %v511_v37 = vpop.f32.mrb[1].mxu1 }
  0xdf   :  { %638 = vst.msk [vmem:[%s1319_s2] sm:$0xff] %vm252_vm0, %v383_v36  ;;  %670 = vst.msk [vmem:[%s1319_s2 + $0x100] sm:$0xff] %vm252_vm0, %v511_v37  ;;  %v813_v38 = vpop.f32.mrb[2].mxu0  ;;  %v845_v39 = vpop.f32.mrb[2].mxu1 }
  0xe0   :  { %641 = vst.msk [vmem:[%s1319_s2 + $0x18] sm:$0xff] %vm252_vm0, %v813_v38  ;;  %673 = vst.msk [vmem:[%s1319_s2 + $0x118] sm:$0xff] %vm252_vm0, %v845_v39  ;;  %v386_v40 = vpop.f32.mrb[3].mxu0  ;;  %v514_v41 = vpop.f32.mrb[3].mxu1 }
  0xe1   :  { %639 = vst.msk [vmem:[%s1319_s2 + $0x8] sm:$0xff] %vm252_vm0, %v386_v40  ;;  %671 = vst.msk [vmem:[%s1319_s2 + $0x108] sm:$0xff] %vm252_vm0, %v514_v41 }
  0xe5   :  { %v816_v42 = vpop.f32.mrb[4].mxu0  ;;  %v848_v43 = vpop.f32.mrb[4].mxu1 }
  0xe6   :  { %644 = vst.msk [vmem:[%s1319_s2 + $0x30] sm:$0xff] %vm252_vm0, %v816_v42  ;;  %676 = vst.msk [vmem:[%s1319_s2 + $0x130] sm:$0xff] %vm252_vm0, %v848_v43  ;;  %v399_v44 = vpop.f32.mrb[5].mxu0  ;;  %v527_v45 = vpop.f32.mrb[5].mxu1 }
  0xe7   :  { %642 = vst.msk [vmem:[%s1319_s2 + $0x20] sm:$0xff] %vm252_vm0, %v399_v44  ;;  %674 = vst.msk [vmem:[%s1319_s2 + $0x120] sm:$0xff] %vm252_vm0, %v527_v45  ;;  %v817_v46 = vpop.f32.mrb[6].mxu0  ;;  %v849_v47 = vpop.f32.mrb[6].mxu1 }
  0xe8   :  { %645 = vst.msk [vmem:[%s1319_s2 + $0x38] sm:$0xff] %vm252_vm0, %v817_v46  ;;  %677 = vst.msk [vmem:[%s1319_s2 + $0x138] sm:$0xff] %vm252_vm0, %v849_v47  ;;  %v402_v48 = vpop.f32.mrb[7].mxu0  ;;  %v530_v49 = vpop.f32.mrb[7].mxu1 }
  0xe9   :  { %643 = vst.msk [vmem:[%s1319_s2 + $0x28] sm:$0xff] %vm252_vm0, %v402_v48  ;;  %675 = vst.msk [vmem:[%s1319_s2 + $0x128] sm:$0xff] %vm252_vm0, %v530_v49 }
  0xed   :  { %v820_v50 = vpop.f32.mrb[8].mxu0  ;;  %v852_v51 = vpop.f32.mrb[8].mxu1 }
  0xee   :  { %648 = vst.msk [vmem:[%s1319_s2 + $0x50] sm:$0xff] %vm252_vm0, %v820_v50  ;;  %680 = vst.msk [vmem:[%s1319_s2 + $0x150] sm:$0xff] %vm252_vm0, %v852_v51  ;;  %v415_v52 = vpop.f32.mrb[9].mxu0  ;;  %v543_v53 = vpop.f32.mrb[9].mxu1 }
  0xef   :  { %646 = vst.msk [vmem:[%s1319_s2 + $0x40] sm:$0xff] %vm252_vm0, %v415_v52  ;;  %678 = vst.msk [vmem:[%s1319_s2 + $0x140] sm:$0xff] %vm252_vm0, %v543_v53  ;;  %v821_v54 = vpop.f32.mrb[10].mxu0  ;;  %v853_v55 = vpop.f32.mrb[10].mxu1 }
  0xf0   :  { %649 = vst.msk [vmem:[%s1319_s2 + $0x58] sm:$0xff] %vm252_vm0, %v821_v54  ;;  %681 = vst.msk [vmem:[%s1319_s2 + $0x158] sm:$0xff] %vm252_vm0, %v853_v55  ;;  %v418_v56 = vpop.f32.mrb[11].mxu0  ;;  %v546_v57 = vpop.f32.mrb[11].mxu1 }
  0xf1   :  { %647 = vst.msk [vmem:[%s1319_s2 + $0x48] sm:$0xff] %vm252_vm0, %v418_v56  ;;  %679 = vst.msk [vmem:[%s1319_s2 + $0x148] sm:$0xff] %vm252_vm0, %v546_v57 }
  0xf5   :  { %v824_v58 = vpop.f32.mrb[12].mxu0  ;;  %v856_v59 = vpop.f32.mrb[12].mxu1 }
  0xf6   :  { %652 = vst.msk [vmem:[%s1319_s2 + $0x70] sm:$0xff] %vm252_vm0, %v824_v58  ;;  %684 = vst.msk [vmem:[%s1319_s2 + $0x170] sm:$0xff] %vm252_vm0, %v856_v59  ;;  %v431_v60 = vpop.f32.mrb[13].mxu0  ;;  %v559_v61 = vpop.f32.mrb[13].mxu1 }
  0xf7   :  { %650 = vst.msk [vmem:[%s1319_s2 + $0x60] sm:$0xff] %vm252_vm0, %v431_v60  ;;  %682 = vst.msk [vmem:[%s1319_s2 + $0x160] sm:$0xff] %vm252_vm0, %v559_v61  ;;  %v825_v62 = vpop.f32.mrb[14].mxu0  ;;  %v857_v63 = vpop.f32.mrb[14].mxu1 }
  0xf8   :  { %653 = vst.msk [vmem:[%s1319_s2 + $0x78] sm:$0xff] %vm252_vm0, %v825_v62  ;;  %685 = vst.msk [vmem:[%s1319_s2 + $0x178] sm:$0xff] %vm252_vm0, %v857_v63  ;;  %v434_v0 = vpop.f32.mrb[15].mxu0  ;;  %v562_v1 = vpop.f32.mrb[15].mxu1 }
  0xf9   :  { %651 = vst.msk [vmem:[%s1319_s2 + $0x68] sm:$0xff] %vm252_vm0, %v434_v0  ;;  %683 = vst.msk [vmem:[%s1319_s2 + $0x168] sm:$0xff] %vm252_vm0, %v562_v1 }
  0xfd   :  { %v828_v2 = vpop.f32.mrb[16].mxu0  ;;  %v860_v3 = vpop.f32.mrb[16].mxu1 }
  0xfe   :  { %656 = vst.msk [vmem:[%s1319_s2 + $0x90] sm:$0xff] %vm252_vm0, %v828_v2  ;;  %688 = vst.msk [vmem:[%s1319_s2 + $0x190] sm:$0xff] %vm252_vm0, %v860_v3  ;;  %v447_v4 = vpop.f32.mrb[17].mxu0  ;;  %v575_v5 = vpop.f32.mrb[17].mxu1 }
  0xff   :  { %654 = vst.msk [vmem:[%s1319_s2 + $0x80] sm:$0xff] %vm252_vm0, %v447_v4  ;;  %686 = vst.msk [vmem:[%s1319_s2 + $0x180] sm:$0xff] %vm252_vm0, %v575_v5  ;;  %v829_v6 = vpop.f32.mrb[18].mxu0  ;;  %v861_v7 = vpop.f32.mrb[18].mxu1 }
 0x100   :  { %657 = vst.msk [vmem:[%s1319_s2 + $0x98] sm:$0xff] %vm252_vm0, %v829_v6  ;;  %689 = vst.msk [vmem:[%s1319_s2 + $0x198] sm:$0xff] %vm252_vm0, %v861_v7  ;;  %v450_v8 = vpop.f32.mrb[19].mxu0  ;;  %v578_v9 = vpop.f32.mrb[19].mxu1 }
 0x101   :  { %655 = vst.msk [vmem:[%s1319_s2 + $0x88] sm:$0xff] %vm252_vm0, %v450_v8  ;;  %687 = vst.msk [vmem:[%s1319_s2 + $0x188] sm:$0xff] %vm252_vm0, %v578_v9 }
 0x105   :  { %v832_v10 = vpop.f32.mrb[20].mxu0  ;;  %v864_v11 = vpop.f32.mrb[20].mxu1 }
 0x106   :  { %660 = vst.msk [vmem:[%s1319_s2 + $0xb0] sm:$0xff] %vm252_vm0, %v832_v10  ;;  %692 = vst.msk [vmem:[%s1319_s2 + $0x1b0] sm:$0xff] %vm252_vm0, %v864_v11  ;;  %v463_v12 = vpop.f32.mrb[21].mxu0  ;;  %v591_v13 = vpop.f32.mrb[21].mxu1 }
 0x107   :  { %658 = vst.msk [vmem:[%s1319_s2 + $0xa0] sm:$0xff] %vm252_vm0, %v463_v12  ;;  %690 = vst.msk [vmem:[%s1319_s2 + $0x1a0] sm:$0xff] %vm252_vm0, %v591_v13  ;;  %v833_v14 = vpop.f32.mrb[22].mxu0  ;;  %v865_v15 = vpop.f32.mrb[22].mxu1 }
 0x108   :  { %661 = vst.msk [vmem:[%s1319_s2 + $0xb8] sm:$0xff] %vm252_vm0, %v833_v14  ;;  %693 = vst.msk [vmem:[%s1319_s2 + $0x1b8] sm:$0xff] %vm252_vm0, %v865_v15  ;;  %v466_v16 = vpop.f32.mrb[23].mxu0  ;;  %v594_v17 = vpop.f32.mrb[23].mxu1 }
 0x109   :  { %659 = vst.msk [vmem:[%s1319_s2 + $0xa8] sm:$0xff] %vm252_vm0, %v466_v16  ;;  %691 = vst.msk [vmem:[%s1319_s2 + $0x1a8] sm:$0xff] %vm252_vm0, %v594_v17 }
 0x10d   :  { %v836_v18 = vpop.f32.mrb[24].mxu0  ;;  %v868_v19 = vpop.f32.mrb[24].mxu1 }
 0x10e   :  { %664 = vst.msk [vmem:[%s1319_s2 + $0xd0] sm:$0xff] %vm252_vm0, %v836_v18  ;;  %696 = vst.msk [vmem:[%s1319_s2 + $0x1d0] sm:$0xff] %vm252_vm0, %v868_v19  ;;  %v479_v20 = vpop.f32.mrb[25].mxu0  ;;  %v607_v21 = vpop.f32.mrb[25].mxu1 }
 0x10f   :  { %662 = vst.msk [vmem:[%s1319_s2 + $0xc0] sm:$0xff] %vm252_vm0, %v479_v20  ;;  %694 = vst.msk [vmem:[%s1319_s2 + $0x1c0] sm:$0xff] %vm252_vm0, %v607_v21  ;;  %v837_v22 = vpop.f32.mrb[26].mxu0  ;;  %v869_v23 = vpop.f32.mrb[26].mxu1 }
 0x110   :  { %665 = vst.msk [vmem:[%s1319_s2 + $0xd8] sm:$0xff] %vm252_vm0, %v837_v22  ;;  %697 = vst.msk [vmem:[%s1319_s2 + $0x1d8] sm:$0xff] %vm252_vm0, %v869_v23  ;;  %v482_v24 = vpop.f32.mrb[27].mxu0  ;;  %v610_v25 = vpop.f32.mrb[27].mxu1 }
 0x111   :  { %663 = vst.msk [vmem:[%s1319_s2 + $0xc8] sm:$0xff] %vm252_vm0, %v482_v24  ;;  %695 = vst.msk [vmem:[%s1319_s2 + $0x1c8] sm:$0xff] %vm252_vm0, %v610_v25 }
 0x115   :  { %v840_v26 = vpop.f32.mrb[28].mxu0  ;;  %v872_v27 = vpop.f32.mrb[28].mxu1 }
 0x116   :  { %668 = vst.msk [vmem:[%s1319_s2 + $0xf0] sm:$0xff] %vm252_vm0, %v840_v26  ;;  %700 = vst.msk [vmem:[%s1319_s2 + $0x1f0] sm:$0xff] %vm252_vm0, %v872_v27  ;;  %v495_v28 = vpop.f32.mrb[29].mxu0  ;;  %v623_v29 = vpop.f32.mrb[29].mxu1 }
 0x117   :  { %666 = vst.msk [vmem:[%s1319_s2 + $0xe0] sm:$0xff] %vm252_vm0, %v495_v28  ;;  %698 = vst.msk [vmem:[%s1319_s2 + $0x1e0] sm:$0xff] %vm252_vm0, %v623_v29  ;;  %v841_v30 = vpop.f32.mrb[30].mxu0  ;;  %v873_v31 = vpop.f32.mrb[30].mxu1 }
 0x118   :  { %669 = vst.msk [vmem:[%s1319_s2 + $0xf8] sm:$0xff] %vm252_vm0, %v841_v30  ;;  %701 = vst.msk [vmem:[%s1319_s2 + $0x1f8] sm:$0xff] %vm252_vm0, %v873_v31  ;;  %v498_v32 = vpop.f32.mrb[31].mxu0  ;;  %v626_v33 = vpop.f32.mrb[31].mxu1 }
 0x119   :  { %667 = vst.msk [vmem:[%s1319_s2 + $0xe8] sm:$0xff] %vm252_vm0, %v498_v32  ;;  %699 = vst.msk [vmem:[%s1319_s2 + $0x1e8] sm:$0xff] %vm252_vm0, %v626_v33 }

</bundles_post_ra>
